<compile_context>
chip_gen: v7x
topology: tpu7x:2x2x1
jax: 0.10.0
libtpu: 0.0.40
codegen_flags: <defaults>
</compile_context>

<pallas_src>
import functools

import jax
import jax.numpy as jnp
from jax.experimental import pallas as pl
from jax.experimental.pallas import tpu as pltpu

_LANE = 128


def _round_up(x, m):
    return ((x + m - 1) // m) * m


def _sublane(dtype):
    # Minimum second-minor tile: 8 for 4-byte, 16 for 2-byte, 32 for 1-byte dtypes.
    return {4: 8, 2: 16, 1: 32}.get(jnp.dtype(dtype).itemsize, 8)


def _vmem_budgets():
    """(per-kernel VMEM target bytes, resident-W byte budget), generation aware."""
    try:
        cap = int(pltpu.get_tpu_info().vmem_capacity_bytes)
    except Exception:  # no TPU info at trace time -> be conservative (assume v7x)
        cap = 64 << 20
    if cap <= (96 << 20):            # v7x: 64 MiB VMEM per TensorCore
        return 48 << 20, 12 << 20
    return 100 << 20, 24 << 20       # v5e / v6e: 128 MiB VMEM


def _plan(M, K, N, dtype):
    """Static (trace-time) path / tile selection."""
    itemsize = jnp.dtype(dtype).itemsize
    sub = _sublane(dtype)
    vmem_budget, w_budget = _vmem_budgets()
    Np = _round_up(N, _LANE)

    # ---- Resident-W fast path: whole (K, N) weight stays in VMEM, no K reduction ----
    if K * Np * itemsize <= w_budget:
        tn = Np
        tm = min(_round_up(M, sub), 512)
        fp = lambda t: 2 * (t * K + K * tn + t * tn) * itemsize  # double-buffered est.
        while fp(tm) > int(0.9 * vmem_budget) and tm > sub:
            tm = max(sub, _round_up(tm // 2, sub))
        if fp(tm) <= int(0.9 * vmem_budget):
            # Give the second v7x TensorCore work when the parallel grid would be 1x1.
            # Prefer a lane-dense N split (keeps full MXU rows); M split only if M big.
            if pl.cdiv(M, tm) * pl.cdiv(N, tn) == 1:
                if Np >= 2 * _LANE:
                    tn = _round_up(Np // 2, _LANE)
                elif M >= 256:
                    tm = _round_up((M + 1) // 2, sub)
            vmem_limit = min(max(fp(tm) + (8 << 20), 32 << 20), vmem_budget)
            return dict(path="resident", tm=tm, tn=tn, vmem_limit=vmem_limit)

    # ---- General K-streaming path ----------------------------------------------------
    Kp = _round_up(K, _LANE)
    tk = next(t for t in (512, 384, 256, 128) if Kp % t == 0)
    tm = min(_round_up(M, sub), 512)
    tn = min(Np, 1024)
    nbuf_w = 3 if tm <= 64 else 2          # deeper W buffering when the matmul is short
    est = (2 * tm * tk + nbuf_w * tk * tn + 2 * tm * tn) * itemsize + tm * tn * 4
    vmem_limit = min(max(2 * est, 32 << 20), vmem_budget)
    return dict(path="stream", tm=tm, tn=tn, tk=tk, Kp=Kp, nbuf_w=nbuf_w,
                vmem_limit=vmem_limit)


def _make_noacc_kernel(compute_dtype):
    """Single-K-block matmul: whole K resident, write straight to the output."""
    def kernel(x_ref, w_ref, o_ref):
        a, b = x_ref[...], w_ref[...]
        if compute_dtype is not None:
            a, b = a.astype(compute_dtype), b.astype(compute_dtype)
        o_ref[...] = jnp.dot(a, b, preferred_element_type=jnp.float32).astype(o_ref.dtype)
    return kernel


def _make_acc_out_kernel(compute_dtype):
    """K-streaming matmul, f32 output: accumulate directly into the output block
    (resident across k since its index_map is constant in k); no scratch, no copy."""
    def kernel(x_ref, w_ref, o_ref):
        @pl.when(pl.program_id(2) == 0)
        def _():
            o_ref[...] = jnp.zeros_like(o_ref)
        a, b = x_ref[...], w_ref[...]
        if compute_dtype is not None:
            a, b = a.astype(compute_dtype), b.astype(compute_dtype)
        o_ref[...] += jnp.dot(a, b, preferred_element_type=jnp.float32)
    return kernel


def _make_acc_scratch_kernel(compute_dtype):
    """K-streaming matmul, non-f32 output: f32 scratch accumulator + final cast."""
    def kernel(x_ref, w_ref, o_ref, acc_ref):
        @pl.when(pl.program_id(2) == 0)
        def _():
            acc_ref[...] = jnp.zeros_like(acc_ref)
        a, b = x_ref[...], w_ref[...]
        if compute_dtype is not None:
            a, b = a.astype(compute_dtype), b.astype(compute_dtype)
        acc_ref[...] += jnp.dot(a, b, preferred_element_type=jnp.float32)

        @pl.when(pl.program_id(2) == pl.num_programs(2) - 1)
        def _():
            o_ref[...] = acc_ref[...].astype(o_ref.dtype)
    return kernel


@functools.partial(jax.jit, static_argnames=("use_bf16",))
def gap_junction_forward(x, w, *, use_bf16=False):
    """Pallas equivalent of GapJunctionSynapticTransmission.forward: x @ synaptic_weights."""
    M, K = x.shape
    K2, N = w.shape
    assert K == K2, f"inner dims mismatch: {K} vs {K2}"
    itemsize = jnp.dtype(x.dtype).itemsize
    out_dtype = jnp.result_type(x.dtype, w.dtype)
    compute_dtype = jnp.bfloat16 if use_bf16 else None

    p = _plan(M, K, N, x.dtype)
    cost = pl.CostEstimate(flops=2 * M * K * N, transcendentals=0,
                           bytes_accessed=(M * K + K * N + M * N) * itemsize)

    if p["path"] == "resident":
        tm, tn = p["tm"], p["tn"]
        return pl.pallas_call(
            _make_noacc_kernel(compute_dtype),
            out_shape=jax.ShapeDtypeStruct((M, N), out_dtype),
            grid_spec=pltpu.PrefetchScalarGridSpec(
                num_scalar_prefetch=0,
                grid=(pl.cdiv(M, tm), pl.cdiv(N, tn)),
                in_specs=[
                    pl.BlockSpec((tm, K), lambda i, j: (i, 0)),
                    pl.BlockSpec((K, tn), lambda i, j: (0, j)),
                ],
                out_specs=pl.BlockSpec((tm, tn), lambda i, j: (i, j)),
            ),
            compiler_params=pltpu.CompilerParams(
                dimension_semantics=("parallel", "parallel"),
                vmem_limit_bytes=p["vmem_limit"],
            ),
            cost_estimate=cost,
        )(x, w)

    tm, tn, tk, Kp = p["tm"], p["tn"], p["tk"], p["Kp"]
    # Zero-pad K only (required for reduction correctness); ragged M / N edges are
    # handled by the grid + masked boundary blocks, so no full x / w HBM copies.
    if Kp != K:
        x = jnp.pad(x, ((0, 0), (0, Kp - K)))
        w = jnp.pad(w, ((0, Kp - K), (0, 0)))

    if p["nbuf_w"] > 2:
        w_spec = pl.BlockSpec((tk, tn), lambda i, j, k: (k, j),
                              pipeline_mode=pl.Buffered(p["nbuf_w"]))
    else:
        w_spec = pl.BlockSpec((tk, tn), lambda i, j, k: (k, j))

    if out_dtype == jnp.float32:
        kernel, scratch = _make_acc_out_kernel(compute_dtype), ()
    else:
        kernel = _make_acc_scratch_kernel(compute_dtype)
        scratch = (pltpu.VMEM((tm, tn), jnp.float32),)

    return pl.pallas_call(
        kernel,
        out_shape=jax.ShapeDtypeStruct((M, N), out_dtype),
        grid_spec=pltpu.PrefetchScalarGridSpec(
            num_scalar_prefetch=0,
            grid=(pl.cdiv(M, tm), pl.cdiv(N, tn), Kp // tk),
            in_specs=[pl.BlockSpec((tm, tk), lambda i, j, k: (i, k)), w_spec],
            out_specs=pl.BlockSpec((tm, tn), lambda i, j, k: (i, j)),
            scratch_shapes=scratch,
        ),
        compiler_params=pltpu.CompilerParams(
            dimension_semantics=("parallel", "parallel", "arbitrary"),
            vmem_limit_bytes=p["vmem_limit"],
        ),
        cost_estimate=cost,
    )(x, w)


def _xt_kernel(x_ref, e_ref, o_ref):
    # dw-block += x_block^T @ e_block: contract over the M (sublane) axis directly on
    # the MXU via dot_general dimension numbers -- no x.T materialized in HBM or VMEM.
    @pl.when(pl.program_id(2) == 0)
    def _():
        o_ref[...] = jnp.zeros_like(o_ref)
    o_ref[...] += jax.lax.dot_general(
        x_ref[...], e_ref[...],
        dimension_numbers=(((0,), (0,)), ((), ())),
        preferred_element_type=jnp.float32)


@jax.jit
def _xt_matmul(x, e):
    """x: (M, K), e: (M, N)  ->  x.T @ e  (shape (K, N), f32), contracting over M."""
    M, K = x.shape
    M2, N = e.shape
    assert M == M2
    itemsize = jnp.dtype(x.dtype).itemsize
    vmem_budget, _ = _vmem_budgets()

    tko = min(_round_up(K, _LANE), 512)    # output-row tile (columns of x)
    tn = min(_round_up(N, _LANE), 1024)    # output-col tile
    # Reduction dim (M) must be covered exactly: single full-M block when it fits,
    # otherwise zero-pad M and stream it across the last grid axis.
    if 2 * M * (tko + tn) * itemsize <= (16 << 20):
        tmr, Mp = M, M
    else:
        tmr = 512
        Mp = _round_up(M, tmr)
        x = jnp.pad(x, ((0, Mp - M), (0, 0)))
        e = jnp.pad(e, ((0, Mp - M), (0, 0)))

    est = 2 * (tmr * tko + tmr * tn + tko * tn) * itemsize
    cost = pl.CostEstimate(flops=2 * M * K * N, transcendentals=0,
                           bytes_accessed=(M * K + M * N + K * N) * itemsize)
    return pl.pallas_call(
        _xt_kernel,
        out_shape=jax.ShapeDtypeStruct((K, N), jnp.float32),
        grid_spec=pltpu.PrefetchScalarGridSpec(
            num_scalar_prefetch=0,
            grid=(pl.cdiv(K, tko), pl.cdiv(N, tn), Mp // tmr),
            in_specs=[
                pl.BlockSpec((tmr, tko), lambda i, j, m: (m, i)),
                pl.BlockSpec((tmr, tn), lambda i, j, m: (m, j)),
            ],
            out_specs=pl.BlockSpec((tko, tn), lambda i, j, m: (i, j)),
        ),
        compiler_params=pltpu.CompilerParams(
            dimension_semantics=("parallel", "parallel", "arbitrary"),
            vmem_limit_bytes=min(max(2 * est, 32 << 20), vmem_budget),
        ),
        cost_estimate=cost,
    )(x, e)


@jax.jit
def _synaptic_update(x, y, w, lr):
    # One dispatch: err via the forward kernel, dw via the x^T-contraction kernel.
    err = y - gap_junction_forward(x, w)
    return w + lr * _xt_matmul(x, err)


class GapJunctionSynapticTransmissionPallas:
    """JAX/Pallas port of the PyTorch module. `fc1` is initialized for parameter
    parity but (exactly as in the PyTorch spec) does not participate in forward()."""

    def __init__(self, input_size, output_size, key):
        self.input_size = input_size
        self.output_size = output_size
        k_w, k_fc_w, k_fc_b = jax.random.split(key, 3)
        # torch.randn(input_size, output_size) equivalent (deterministic via PRNGKey).
        self.synaptic_weights = jax.random.normal(
            k_w, (input_size, output_size), dtype=jnp.float32)
        # fc1 = nn.Linear(input_size, output_size): initialized but unused in forward().
        bound = 1.0 / (input_size ** 0.5)
        self.fc1_weight = jax.random.uniform(
            k_fc_w, (output_size, input_size), minval=-bound, maxval=bound)
        self.fc1_bias = jax.random.uniform(
            k_fc_b, (output_size,), minval=-bound, maxval=bound)

    def forward(self, x, use_bf16=False):
        return gap_junction_forward(x, self.synaptic_weights, use_bf16=use_bf16)

    def __call__(self, x):
        return self.forward(x)

    def update_synaptic_weights(self, x, y, learning_rate):
        self.synaptic_weights = _synaptic_update(
            x, y, self.synaptic_weights, jnp.float32(learning_rate))


if __name__ == "__main__":
    key = jax.random.PRNGKey(0)
    k_model, k_x, k_y, k_x2, k_w2 = jax.random.split(key, 5)

    # Module-consistent small shapes: batch=16, input_size=32, output_size=64.
    batch, input_size, output_size = 16, 32, 64
    model = GapJunctionSynapticTransmissionPallas(input_size, output_size, k_model)
    x = jax.random.normal(k_x, (batch, input_size), dtype=jnp.float32)

    # Forward (resident-W fast path).
    out = jax.block_until_ready(model.forward(x))
    ref = x @ model.synaptic_weights
    assert out.shape == (batch, output_size)
    assert jnp.allclose(out, ref, atol=1e-5, rtol=1e-5)

    # Optional bf16 MXU path (looser tolerance; numerics intentionally differ).
    out_bf16 = jax.block_until_ready(model.forward(x, use_bf16=True))
    assert jnp.allclose(out_bf16, ref, atol=2e-1, rtol=5e-2)

    # Hebbian-style weight update: x^T @ err kernel, no x.T HBM copy, one dispatch.
    y = jax.random.normal(k_y, (batch, output_size), dtype=jnp.float32)
    w_before = model.synaptic_weights
    model.update_synaptic_weights(x, y, 0.01)
    w_ref = w_before + 0.01 * (x.T @ (y - x @ w_before))
    assert jnp.allclose(model.synaptic_weights, w_ref, atol=1e-3, rtol=1e-3)

    # K-accumulating streaming path (W too large to stay resident in VMEM).
    M2, K2, N2 = 16, 8192, 1024
    x2 = jax.random.normal(k_x2, (M2, K2), dtype=jnp.float32)
    w2 = jax.random.normal(k_w2, (K2, N2), dtype=jnp.float32)
    out2 = jax.block_until_ready(gap_junction_forward(x2, w2))
    ref2 = jnp.dot(x2, w2, precision=jax.lax.Precision.HIGHEST)
    assert out2.shape == (M2, N2)
    assert jnp.allclose(out2, ref2, atol=5e-2, rtol=2e-2)

    print("KERNEL_OK")
</pallas_src>

<mosaic_0001>
module attributes {stable_mosaic.version = 11 : i64} {
  func.func @kernel(%arg0: i32, %arg1: i32, %arg2: memref<16x32xf32, #tpu.memory_space<vmem>>, %arg3: memref<32x128xf32, #tpu.memory_space<vmem>>, %arg4: memref<16x128xf32, #tpu.memory_space<vmem>>) attributes {dimension_semantics = [#tpu.dimension_semantics<parallel>, #tpu.dimension_semantics<parallel>], iteration_bounds = array<i64: 1, 1>, scalar_prefetch = 0 : i64, scratch_operands = 0 : i64, tpu.core_type = #tpu.core_type<tc>, window_params = [{transform_indices = @transform_0, window_bounds = array<i64: 16, 32>}, {transform_indices = @transform_1, window_bounds = array<i64: 32, 128>}, {transform_indices = @transform_2, window_bounds = array<i64: 16, 128>}]} {
    %c0 = arith.constant 0 : index
    %c0_0 = arith.constant 0 : index
    %0 = vector.load %arg2[%c0, %c0_0] : memref<16x32xf32, #tpu.memory_space<vmem>>, vector<16x32xf32>
    %c0_1 = arith.constant 0 : index
    %c0_2 = arith.constant 0 : index
    %1 = vector.load %arg3[%c0_1, %c0_2] : memref<32x128xf32, #tpu.memory_space<vmem>>, vector<32x128xf32>
    %cst = arith.constant dense<0.000000e+00> : vector<16x128xf32>
    %2 = tpu.matmul %0, %1, %cst {dimension_numbers = #tpu.dot_dimension_numbers<[1], [0], [0], [1], [0, 0, 1, 1], [], []>} : vector<16x32xf32>, vector<32x128xf32>, vector<16x128xf32> -> vector<16x128xf32>
    %c0_3 = arith.constant 0 : index
    %c0_4 = arith.constant 0 : index
    %3 = vector.load %arg4[%c0_3, %c0_4] : memref<16x128xf32, #tpu.memory_space<vmem>>, vector<16x128xf32>
    tpu.vector_store %arg4[%c0_3, %c0_4], %2 {strides = array<i32>} : memref<16x128xf32, #tpu.memory_space<vmem>>, vector<16x128xf32>,
    return
  }
  func.func @transform_0(%arg0: i32, %arg1: i32) -> (i32, i32) {
    %c0_i32 = arith.constant 0 : i32
    %c0_i32_0 = arith.constant 0 : i32
    return %arg0, %c0_i32 : i32, i32
  }
  func.func @transform_1(%arg0: i32, %arg1: i32) -> (i32, i32) {
    %c0_i32 = arith.constant 0 : i32
    %c0_i32_0 = arith.constant 0 : i32
    return %c0_i32, %arg1 : i32, i32
  }
  func.func @transform_2(%arg0: i32, %arg1: i32) -> (i32, i32) {
    %c0_i32 = arith.constant 0 : i32
    return %arg0, %arg1 : i32, i32
  }
}

</mosaic_0001>

<bundles_post_ra>
// kernel: gap_junction_forward.1
= control target key start
LH: loop header
LB: loop body
LE: loop exit
PB: predicated region body
PF: predicated region fallthrough
CT: control target
= control target key end

     0   :  { %7 = vsyncpa [#allocation3], 0  ;;  %s317_s0 = inlined_call_operand.hbm [shape: f32[16,32], index: 0, kind: input, shape index: {}]   ;;  %s318_s1 = inlined_call_operand.hbm [shape: f32[32,64], index: 1, kind: input, shape index: {}]   ;;  %s319_s2 = inlined_call_operand.hbm [shape: f32[16,64], index: 2, kind: output, shape index: {}]  }
   0x1   :  { %8 = vsyncpa [#allocation6], 0 }
   0x2   :  { %9 = vsyncpa [#allocation4], 0  ;;  %s252_s9 = smov [#allocation2]   ;;  %s180_s13 = scalar_lea.hbm %s317_s0, 256 }
   0x3   :  { %s15_s10 = sshll.u32 %s252_s9, 4  ;;  %p181_p0 = scmp.ne.s32.totalorder %s317_s0, %s180_s13  ;;  %s16_s10 = int_to_ptr.vmem [resolvable:$true] %s15_s10 }
   0x4   :  { %p184_p1 = scmp.lt.u32.totalorder %s180_s13, %s317_s0 }
   0x6   :  { %p186_p2 = pnand %p184_p1, %p181_p0 }
   0x8   :  { %189 = shalt.err (!%p186_p2)
}
   0x9   :  { %s190_s18 = scalar_lea.vmem %s16_s10, 256  ;;  %p195_p4 = scmp.lt.s32.totalorder %s16_s10, %s16_s10 }
   0xa   :  { %p191_p3 = scmp.ne.s32.totalorder %s16_s10, %s190_s18  ;;  %p196_p5 = scmp.lt.s32.totalorder %s190_s18, %s190_s18 }
   0xc   :  { %p197_p6 = por %p196_p5, %p195_p4 }
   0xe   :  { %p198_p7 = pnand %p197_p6, %p191_p3 }
  0x10   :  { %201 = shalt.err (!%p198_p7)
}
  0x11   :  { %s253_s19 = smov 128   ;;  %s254_s20 = smov 8  }
  0x12   :  { %21 = dma.hbm_to_vmem [thread:$0]  %s317_s0, 256, %s16_s10, [#allocation3], %s253_s19, %s253_s19, %s254_s20  }
  0x13   :  { %s255_s23 = smov [#allocation5]   ;;  %s202_s27 = scalar_lea.hbm %s318_s1, 512 }
  0x14   :  { %s27_s24 = sshll.u32 %s255_s23, 4  ;;  %p203_p8 = scmp.ne.s32.totalorder %s318_s1, %s202_s27  ;;  %s28_s24 = int_to_ptr.vmem [resolvable:$true] %s27_s24 }
  0x15   :  { %p206_p9 = scmp.lt.u32.totalorder %s202_s27, %s318_s1 }
  0x17   :  { %p208_p10 = pnand %p206_p9, %p203_p8 }
  0x19   :  { %211 = shalt.err (!%p208_p10)
}
  0x1a   :  { %s212_s4 = scalar_lea.vmem %s28_s24, 512  ;;  %p217_p12 = scmp.lt.s32.totalorder %s28_s24, %s28_s24 }
  0x1b   :  { %p213_p11 = scmp.ne.s32.totalorder %s28_s24, %s212_s4  ;;  %p218_p13 = scmp.lt.s32.totalorder %s212_s4, %s212_s4 }
  0x1d   :  { %p219_p0 = por %p218_p13, %p217_p12 }
  0x1f   :  { %p220_p1 = pnand %p219_p0, %p213_p11 }
  0x21   :  { %223 = shalt.err (!%p220_p1)
}
  0x22   :  { %33 = dma.hbm_to_vmem [thread:$0]  %s318_s1, 512, %s28_s24, [#allocation6], %s253_s19, %s253_s19, %s254_s20  }
  0x23   :  { %246 = dma.done.wait [#allocation3], 256  }
  0x24   :  { %247 = vsyncadd [#allocation3], 4294967040 }
  0x25   :  { %248 = dma.done.wait [#allocation6], 512  }
  0x26   :  { %249 = vsyncadd [#allocation6], 4294966784  ;;  %vm46_vm0 = vcmask 261120   ;;  %v42_v0 = vld [vmem:[#allocation5] sm:$0xff]  ;;  %v43_v1 = vld [vmem:[#allocation5 + $0x8] sm:$0xff]  ;;  %s256_s1 = smov [#allocation7]  }
  0x27   :  { %v44_v2 = vld [vmem:[#allocation5 + $0x10] sm:$0xff]  ;;  %v167_v3 = vpack.c.bf16 %v43_v1, %v42_v0  ;;  %v45_v4 = vld [vmem:[#allocation5 + $0x18] sm:$0xff]  ;;  %s135_s6 = sshll.u32 %s256_s1, 4  ;;  %s136_s6 = int_to_ptr.vmem [resolvable:$true] %s135_s6 }
  0x28   :  { %v40_v5 = vld [vmem:[#allocation2] sm:$0xff]  ;;  %v171_v6 = vpack.c.bf16 %v45_v4, %v44_v2  ;;  %v41_v7 = vld [vmem:[#allocation2 + $0x8] sm:$0xff]  ;;  %s224_s7 = scalar_lea.vmem %s136_s6, 256  ;;  %p229_p3 = scmp.lt.s32.totalorder %s136_s6, %s136_s6 }
  0x29   :  { %164 = vmatprep.mubr.msk.f32.mxu0 %vm46_vm0, %v40_v5  ;;  %168 = vmatprep.subr.bf16.mxu0 %v167_v3  ;;  %p225_p2 = scmp.ne.s32.totalorder %s136_s6, %s224_s7  ;;  %p230_p4 = scmp.lt.s32.totalorder %s224_s7, %s224_s7 }
  0x2a   :  { %170 = vmatpush3.bf16.msra.mxu0 %v167_v3 }
  0x2b   :  { %172 = vmatprep.subr.bf16.mxu0 %v171_v6  ;;  %p231_p5 = por %p230_p4, %p229_p3 }
  0x2d   :  { %p232_p6 = pnand %p231_p5, %p225_p2 }
  0x2e   :  { %174 = vmatpush3.bf16.msra.mxu0 %v171_v6 }
  0x31   :  { %165 = vmatmul.mubr.msk.f32.vlgmr.msra.gmra.mrb[0].mxu0 %vm46_vm0, %v41_v7 }
 0x104   :  { %v166_v8 = vpop.f32.mrb[0].mxu0 }
 0x105   :  { %129 = vst [vmem:[#allocation7 + $0x8] sm:$0xff] %v166_v8  ;;  %v119_v9 = vpop.f32.mrb[1].mxu0 }
 0x106   :  { %128 = vst [vmem:[#allocation7] sm:$0xff] %v119_v9 }
 0x107   :  { %235 = shalt.err (!%p232_p6)
}
 0x108   :  { %s236_s10 = scalar_lea.hbm %s319_s2, 256 }
 0x109   :  { %p237_p7 = scmp.ne.s32.totalorder %s319_s2, %s236_s10  ;;  %p240_p8 = scmp.lt.u32.totalorder %s236_s10, %s319_s2 }
 0x10b   :  { %p242_p9 = pnand %p240_p8, %p237_p7 }
 0x10d   :  { %245 = shalt.err (!%p242_p9)
}
 0x10e   :  { %141 = dma.vmem_to_hbm [thread:$0]  %s136_s6, 256, %s319_s2, [#allocation4], %s253_s19, %s253_s19, %s254_s20  }
 0x10f   :  { %250 = dma.done.wait [#allocation4], 256  }
 0x110   :  { %251 = vsyncadd [#allocation4], 4294967040 }
 0x111   :  { %145 = vsyncpa [#allocation3], 1 }
 0x112   :  { %146 = vsyncpa [#allocation6], 1 }
 0x113   :  { %147 = vsyncpa [#allocation4], 1 }

</bundles_post_ra>
